<compile_context>
chip_gen: v7x
topology: tpu7x:2x2x1
jax: 0.10.0
libtpu: 0.0.40
codegen_flags: <defaults>
</compile_context>

<pallas_src>
import functools
import math

import jax
import jax.numpy as jnp
from jax.experimental import pallas as pl
from jax.experimental.pallas import tpu as pltpu

COMMANDS = ['yes', 'no', 'up', 'down', 'left', 'right', 'on', 'off', 'stop', 'go']
NUM_CLASSES = len(COMMANDS)

PAD_B = 8            # sublane-aligned rows per output block
PAD_C = 128          # lane-dense output width (sliced to NUM_CLASSES under jit)
HALF_C = PAD_C // 2  # Box-Muller yields 2 normals per bit-draw


def _mix32(x):
    """lowbias32 integer finalizer: uint32 -> well-mixed uint32 (VPU ops only)."""
    x = x ^ (x >> jnp.uint32(16))
    x = x * jnp.uint32(0x7FEB352D)
    x = x ^ (x >> jnp.uint32(15))
    x = x * jnp.uint32(0x846CA68B)
    x = x ^ (x >> jnp.uint32(16))
    return x


def _bits_to_uniform12(bits):
    """uint32 -> f32 uniform in [1, 2): OR 23 random mantissa bits into exp=127."""
    mant = (bits >> jnp.uint32(9)) | jnp.uint32(0x3F800000)
    return jax.lax.bitcast_convert_type(mant, jnp.float32)


def _randn_kernel(seed_ref, out_ref):
    blk = pl.program_id(0)

    # Global element index for this block's half-tile (decorrelates grid blocks).
    row = jax.lax.broadcasted_iota(jnp.int32, (PAD_B, HALF_C), 0)
    col = jax.lax.broadcasted_iota(jnp.int32, (PAD_B, HALF_C), 1)
    gidx = ((blk * PAD_B + row) * HALF_C + col).astype(jnp.uint32)

    key = seed_ref[0].astype(jnp.uint32) * jnp.uint32(0x9E3779B9)
    bits1 = _mix32(gidx ^ key)
    bits2 = _mix32((gidx + jnp.uint32(0x85EBCA6B)) ^ key)

    u1 = _bits_to_uniform12(bits1)   # [1, 2)
    u2 = _bits_to_uniform12(bits2)   # [1, 2)

    # Box-Muller with BOTH outputs; 2 - u1 is in (0, 1], so log needs no clamp.
    r = jnp.sqrt(jnp.float32(-2.0) * jnp.log(jnp.float32(2.0) - u1))
    theta = jnp.float32(2.0 * math.pi) * (u2 - jnp.float32(1.0))
    z0 = r * jnp.cos(theta)
    z1 = r * jnp.sin(theta)

    # Single lane-dense (8, 128) store.
    out_ref[...] = jnp.concatenate([z0, z1], axis=-1)


@functools.partial(jax.jit, static_argnums=(1,))
def _forward_impl(seed_arr, batch):
    num_blocks = pl.cdiv(batch, PAD_B)
    padded = pl.pallas_call(
        _randn_kernel,
        out_shape=jax.ShapeDtypeStruct((num_blocks * PAD_B, PAD_C), jnp.float32),
        grid=(num_blocks,),
        in_specs=[pl.BlockSpec(memory_space=pltpu.MemorySpace.SMEM)],
        out_specs=pl.BlockSpec((PAD_B, PAD_C), lambda i: (i, 0)),
        compiler_params=pltpu.CompilerParams(
            dimension_semantics=("parallel",)),  # v7x: rows split across 2 TCs
    )(seed_arr)
    # Slice fuses under jit: no extra HBM allocation / copy per call.
    return padded[:batch, :NUM_CLASSES]


@functools.lru_cache(maxsize=None)
def _seed_array(seed):
    return jnp.asarray([seed], dtype=jnp.int32)


def dummy_cnn_forward(x, seed=0):
    """Pallas equivalent of DummyCNN.forward: randn(x.shape[0], NUM_CLASSES)."""
    return _forward_impl(_seed_array(int(seed)), x.shape[0])


def init_params(num_classes=NUM_CLASSES):
    """Deterministic init of the Linear(1, num_classes) that forward() never uses."""
    kw, kb = jax.random.split(jax.random.PRNGKey(42))
    bound = 1.0  # PyTorch Linear init bound = 1/sqrt(fan_in) with fan_in = 1
    weight = jax.random.uniform(kw, (num_classes, 1), jnp.float32, -bound, bound)
    bias = jax.random.uniform(kb, (num_classes,), jnp.float32, -bound, bound)
    # NOTE: like the PyTorch module, forward() never uses these parameters.
    return {"linear_w": weight, "linear_b": bias}


if __name__ == "__main__":
    key = jax.random.PRNGKey(0)
    # (batch, channels, length) NCL tensor, as AdaptiveAvgPool1d would expect.
    x = jax.random.normal(key, (2, 1, 128), dtype=jnp.float32)

    params = init_params()  # mirrors __init__; unused by forward (as in PyTorch)

    out = dummy_cnn_forward(x, seed=0)
    out = jax.block_until_ready(out)

    assert out.shape == (x.shape[0], NUM_CLASSES), out.shape
    assert out.dtype == jnp.float32
    assert bool(jnp.all(jnp.isfinite(out)))
    print("KERNEL_OK")
</pallas_src>

<mosaic_0001>
module attributes {stable_mosaic.version = 11 : i64} {
  func.func @_randn_kernel(%arg0: i32, %arg1: memref<1xi32, #tpu.memory_space<smem>>, %arg2: memref<8x128xf32, #tpu.memory_space<vmem>>) attributes {dimension_semantics = [#tpu.dimension_semantics<parallel>], iteration_bounds = array<i64: 1>, scalar_prefetch = 0 : i64, scratch_operands = 0 : i64, tpu.core_type = #tpu.core_type<tc>, window_params = [{transform_indices = @transform_0, window_bounds = array<i64: 1>}, {transform_indices = @transform_1, window_bounds = array<i64: 8, 128>}]} {
    %0 = tpu.iota {dimensions = array<i32: 0>} : vector<8x64xi32>
    %1 = tpu.iota {dimensions = array<i32: 1>} : vector<8x64xi32>
    %c8_i32 = arith.constant 8 : i32
    %2 = arith.muli %arg0, %c8_i32 : i32
    %3 = vector.broadcast %2 : i32 to vector<8x64xi32>
    %4 = arith.addi %3, %0 : vector<8x64xi32>
    %c64_i32 = arith.constant 64 : i32
    %5 = vector.broadcast %c64_i32 : i32 to vector<8x64xi32>
    %6 = arith.muli %4, %5 : vector<8x64xi32>
    %7 = arith.addi %6, %1 : vector<8x64xi32>
    %c0 = arith.constant 0 : index
    %8 = memref.load %arg1[%c0] : memref<1xi32, #tpu.memory_space<smem>>
    %c-1640531527_i32 = arith.constant -1640531527 : i32
    %9 = arith.muli %8, %c-1640531527_i32 : i32
    %10 = vector.broadcast %9 : i32 to vector<8x64xi32>
    %11 = arith.xori %7, %10 : vector<8x64xi32>
    %c16_i32 = arith.constant 16 : i32
    %12 = vector.broadcast %c16_i32 : i32 to vector<8x64xi32>
    %13 = arith.shrui %11, %12 : vector<8x64xi32>
    %14 = arith.xori %11, %13 : vector<8x64xi32>
    %c2146121005_i32 = arith.constant 2146121005 : i32
    %15 = vector.broadcast %c2146121005_i32 : i32 to vector<8x64xi32>
    %16 = arith.muli %14, %15 : vector<8x64xi32>
    %c15_i32 = arith.constant 15 : i32
    %17 = vector.broadcast %c15_i32 : i32 to vector<8x64xi32>
    %18 = arith.shrui %16, %17 : vector<8x64xi32>
    %19 = arith.xori %16, %18 : vector<8x64xi32>
    %c-2073254261_i32 = arith.constant -2073254261 : i32
    %20 = vector.broadcast %c-2073254261_i32 : i32 to vector<8x64xi32>
    %21 = arith.muli %19, %20 : vector<8x64xi32>
    %c16_i32_0 = arith.constant 16 : i32
    %22 = vector.broadcast %c16_i32_0 : i32 to vector<8x64xi32>
    %23 = arith.shrui %21, %22 : vector<8x64xi32>
    %24 = arith.xori %21, %23 : vector<8x64xi32>
    %c-2048144789_i32 = arith.constant -2048144789 : i32
    %25 = vector.broadcast %c-2048144789_i32 : i32 to vector<8x64xi32>
    %26 = arith.addi %7, %25 : vector<8x64xi32>
    %27 = vector.broadcast %9 : i32 to vector<8x64xi32>
    %28 = arith.xori %26, %27 : vector<8x64xi32>
    %c16_i32_1 = arith.constant 16 : i32
    %29 = vector.broadcast %c16_i32_1 : i32 to vector<8x64xi32>
    %30 = arith.shrui %28, %29 : vector<8x64xi32>
    %31 = arith.xori %28, %30 : vector<8x64xi32>
    %c2146121005_i32_2 = arith.constant 2146121005 : i32
    %32 = vector.broadcast %c2146121005_i32_2 : i32 to vector<8x64xi32>
    %33 = arith.muli %31, %32 : vector<8x64xi32>
    %c15_i32_3 = arith.constant 15 : i32
    %34 = vector.broadcast %c15_i32_3 : i32 to vector<8x64xi32>
    %35 = arith.shrui %33, %34 : vector<8x64xi32>
    %36 = arith.xori %33, %35 : vector<8x64xi32>
    %c-2073254261_i32_4 = arith.constant -2073254261 : i32
    %37 = vector.broadcast %c-2073254261_i32_4 : i32 to vector<8x64xi32>
    %38 = arith.muli %36, %37 : vector<8x64xi32>
    %c16_i32_5 = arith.constant 16 : i32
    %39 = vector.broadcast %c16_i32_5 : i32 to vector<8x64xi32>
    %40 = arith.shrui %38, %39 : vector<8x64xi32>
    %41 = arith.xori %38, %40 : vector<8x64xi32>
    %c9_i32 = arith.constant 9 : i32
    %42 = vector.broadcast %c9_i32 : i32 to vector<8x64xi32>
    %43 = arith.shrui %24, %42 : vector<8x64xi32>
    %c1065353216_i32 = arith.constant 1065353216 : i32
    %44 = vector.broadcast %c1065353216_i32 : i32 to vector<8x64xi32>
    %45 = arith.ori %43, %44 : vector<8x64xi32>
    %46 = tpu.bitcast %45 : vector<8x64xi32> -> vector<8x64xf32>
    %c9_i32_6 = arith.constant 9 : i32
    %47 = vector.broadcast %c9_i32_6 : i32 to vector<8x64xi32>
    %48 = arith.shrui %41, %47 : vector<8x64xi32>
    %c1065353216_i32_7 = arith.constant 1065353216 : i32
    %49 = vector.broadcast %c1065353216_i32_7 : i32 to vector<8x64xi32>
    %50 = arith.ori %48, %49 : vector<8x64xi32>
    %51 = tpu.bitcast %50 : vector<8x64xi32> -> vector<8x64xf32>
    %cst = arith.constant 2.000000e+00 : f32
    %52 = vector.broadcast %cst : f32 to vector<8x64xf32>
    %53 = arith.subf %52, %46 : vector<8x64xf32>
    %54 = math.log %53 : vector<8x64xf32>
    %cst_8 = arith.constant -2.000000e+00 : f32
    %55 = vector.broadcast %cst_8 : f32 to vector<8x64xf32>
    %56 = arith.mulf %55, %54 : vector<8x64xf32>
    %57 = math.sqrt %56 : vector<8x64xf32>
    %cst_9 = arith.constant 1.000000e+00 : f32
    %58 = vector.broadcast %cst_9 : f32 to vector<8x64xf32>
    %59 = arith.subf %51, %58 : vector<8x64xf32>
    %cst_10 = arith.constant 6.28318548 : f32
    %60 = vector.broadcast %cst_10 : f32 to vector<8x64xf32>
    %61 = arith.mulf %60, %59 : vector<8x64xf32>
    %62 = math.cos %61 : vector<8x64xf32>
    %63 = arith.mulf %57, %62 : vector<8x64xf32>
    %64 = math.sin %61 : vector<8x64xf32>
    %65 = arith.mulf %57, %64 : vector<8x64xf32>
    %66 = tpu.concatenate %63, %65 in 1 : vector<8x64xf32>, vector<8x64xf32> -> vector<8x128xf32>
    %c0_11 = arith.constant 0 : index
    %c0_12 = arith.constant 0 : index
    %67 = vector.load %arg2[%c0_11, %c0_12] : memref<8x128xf32, #tpu.memory_space<vmem>>, vector<8x128xf32>
    tpu.vector_store %arg2[%c0_11, %c0_12], %66 {strides = array<i32>} : memref<8x128xf32, #tpu.memory_space<vmem>>, vector<8x128xf32>,
    return
  }
  func.func @transform_0(%arg0: i32) -> i32 {
    %c0_i32 = arith.constant 0 : i32
    %c0_i32_0 = arith.constant 0 : i32
    return %c0_i32 : i32
  }
  func.func @transform_1(%arg0: i32) -> (i32, i32) {
    %c0_i32 = arith.constant 0 : i32
    %c0_i32_0 = arith.constant 0 : i32
    return %arg0, %c0_i32 : i32, i32
  }
}

</mosaic_0001>

<bundles_post_ra>
// kernel: _forward_impl.1
= control target key start
LH: loop header
LB: loop body
LE: loop exit
PB: predicated region body
PF: predicated region fallthrough
CT: control target
= control target key end

     0   :  { %v9_v0 = vlaneseq  ;;  %v307_v36 = vmov 683565275   ;;  %v308_v38 = vmov 2475754826   ;;  %v309_v40 = vmov 2131351028   ;;  %s354_s0 = inlined_call_operand.<no memory space> [shape: s32[1], index: 0, kind: input, shape index: {}]   ;;  %s355_s1 = inlined_call_operand.vmem [shape: f32[8,128], index: 1, kind: output, shape index: {}]  }
   0x1   :  { %s19_s8 = smul.u32 2654435769, %s354_s0  ;;  %v310_v43 = vmov 2102212464   ;;  %v311_v45 = vmov 920167782  }
   0x2   :  { %v10_v1 = vshrl.u32 %v9_v0, 7  ;;  %v12_v2 = vand.u32 127, %v9_v0  ;;  %v312_v53 = vmov 1326507024   ;;  %s313_s0 = smov 64  }
   0x3   :  { %v20_v5 = vstv %s19_s8 }
   0x4   :  { %v16_v3 = vmul.u32 64, %v10_v1 }
   0x6   :  { %v17_v4 = vadd.s32 %v16_v3, %v12_v2 }
   0x8   :  { %v30_v6 = vadd.s32 2246822507, %v17_v4  ;;  %v21_v15 = vxor.u32 %v20_v5, %v17_v4 }
   0xa   :  { %v31_v7 = vxor.u32 %v30_v6, %v20_v5  ;;  %v22_v18 = vshrl.u32 %v21_v15, 16 }
   0xc   :  { %v32_v8 = vshrl.u32 %v31_v7, 16  ;;  %v23_v21 = vxor.u32 %v22_v18, %v21_v15 }
   0xe   :  { %v33_v9 = vxor.u32 %v32_v8, %v31_v7  ;;  %v24_v24 = vmul.u32 2146121005, %v23_v21 }
  0x10   :  { %v34_v10 = vmul.u32 2146121005, %v33_v9  ;;  %v25_v28 = vshrl.u32 %v24_v24, 15 }
  0x12   :  { %v35_v11 = vshrl.u32 %v34_v10, 15  ;;  %v26_v32 = vxor.u32 %v25_v28, %v24_v24 }
  0x14   :  { %v36_v12 = vxor.u32 %v35_v11, %v34_v10  ;;  %v27_v47 = vmul.u32 2221713035, %v26_v32 }
  0x16   :  { %v37_v13 = vmul.u32 2221713035, %v36_v12  ;;  %v28_v0 = vshrl.u32 %v27_v47, 16 }
  0x18   :  { %v38_v14 = vshrl.u32 %v37_v13, 16  ;;  %v29_v11 = vxor.u32 %v28_v0, %v27_v47 }
  0x1a   :  { %v39_v16 = vxor.u32 %v38_v14, %v37_v13 }
  0x1c   :  { %v43_v17 = vshrl.u32 %v39_v16, 9  ;;  %v40_v16 = vshrl.u32 %v29_v11, 9 }
  0x1e   :  { %v44_v19 = vor.u32 1065353216, %v43_v17 }
  0x20   :  { %v279_v20 = vadd.f32 -1.0, %v44_v19 }
  0x22   :  { %v327_v22 = vmul.f32 6.2831855, %v279_v20  ;;  %v41_v20 = vor.u32 1065353216, %v40_v16 }
  0x24   :  { %v62_v23 = vand.u32 2139095040, %v327_v22  ;;  %v59_v27 = vand.u32 2147483647, %v327_v22  ;;  %v46_v24 = vsub.f32 2.0, %v41_v20  ;;  %vm61_vm7 = vcmp.lt.s32.totalorder %v327_v22, 0 }
  0x26   :  { %v63_v25 = vshrl.u32 %v62_v23, 23  ;;  %v66_v30 = vand.u32 8388607, %v59_v27  ;;  %299 = vlog2.f32 %v46_v24  ;;  %vm60_vm8 = vcmp.le.f32.partialorder %v59_v27, 0.7853982 }
  0x28   :  { %v280_v26 = vadd.s32 4294967169, %v63_v25  ;;  %v67_v42 = vor.u32 8388608, %v66_v30 }
  0x2a   :  { %v69_v29 = vadd.s32 1, %v280_v26  ;;  %v107_v60 = vshll.u32 %v67_v42, 8 }
  0x2c   :  { %vm70_vm0 = vcmp.gt.s32.totalorder %v69_v29, 0 }
  0x2d   :  { %v71_v31 = vsel %vm70_vm0, %v69_v29, 0 }
  0x2e   :  { %v73_v33 = vand.u32 31, %v71_v31  ;;  %v72_v34 = vshrl.u32 %v71_v31, 5 }
  0x30   :  { %v74_v35 = vsub.s32 32, %v73_v33  ;;  %v76_v37 = vshll.u32 %v307_v36, %v73_v33  ;;  %v79_v39 = vshll.u32 %v308_v38, %v73_v33  ;;  %v82_v41 = vshll.u32 %v309_v40, %v73_v33 }
  0x31   :  { %v85_v44 = vshll.u32 %v310_v43, %v73_v33  ;;  %v88_v46 = vshll.u32 %v311_v45, %v73_v33  ;;  %vm91_vm1 = vcmp.lt.s32.totalorder %v72_v34, 1  ;;  %vm94_vm2 = vcmp.lt.s32.totalorder %v72_v34, 4  ;;  %v300_v33 = vpop.eup %299 }
  0x32   :  { %v77_v48 = vshrl.u32 %v308_v38, %v74_v35  ;;  %v80_v49 = vshrl.u32 %v309_v40, %v74_v35  ;;  %v83_v50 = vshrl.u32 %v310_v43, %v74_v35  ;;  %v75_v51 = vshrl.u32 %v307_v36, %v74_v35 }
  0x33   :  { %v86_v52 = vshrl.u32 %v311_v45, %v74_v35  ;;  %v89_v54 = vshrl.u32 %v312_v53, %v74_v35  ;;  %vm93_vm3 = vcmp.lt.s32.totalorder %v72_v34, 3  ;;  %vm92_vm4 = vcmp.lt.s32.totalorder %v72_v34, 2 }
  0x34   :  { %v78_v55 = vor.u32 %v77_v48, %v76_v37  ;;  %v81_v56 = vor.u32 %v80_v49, %v79_v39  ;;  %v84_v57 = vor.u32 %v83_v50, %v82_v41  ;;  %v48_v38 = vmul.f32 0.6931472, %v300_v33 }
  0x35   :  { %v87_v58 = vor.u32 %v86_v52, %v85_v44  ;;  %v90_v59 = vor.u32 %v89_v54, %v88_v46 }
  0x36   :  { %v96_v61 = vsel %vm94_vm2, %v84_v57, 2102212464  ;;  %v99_v62 = vsel %vm91_vm1, %v78_v55, %v81_v56  ;;  %v103_v63 = vsel %vm91_vm1, %v81_v56, %v84_v57  ;;  %v95_v3 = vsel %vm91_vm1, %v75_v51, %v78_v55 }
  0x37   :  { %v100_v1 = vsel %vm94_vm2, %v87_v58, 920167782  ;;  %v104_v2 = vsel %vm94_vm2, %v90_v59, 1326507024  ;;  %v97_v4 = vsel %vm93_vm3, %v81_v56, %v96_v61  ;;  %v49_v43 = vmul.f32 -2.0, %v48_v38 }
  0x38   :  { %v101_v5 = vsel %vm93_vm3, %v84_v57, %v100_v1  ;;  %v105_v6 = vsel %vm93_vm3, %v87_v58, %v104_v2  ;;  %v98_v12 = vsel %vm92_vm4, %v95_v3, %v97_v4  ;;  %vm151_vm1 = vweird.f32 %v327_v22 }
  0x39   :  { %v102_v7 = vsel %vm92_vm4, %v99_v62, %v101_v5  ;;  %v106_v8 = vsel %vm92_vm4, %v103_v63, %v105_v6  ;;  %v114_v15 = vmul.u32 %v107_v60, %v98_v12  ;;  %301 = vrsqrt.f32 %v49_v43 }
  0x3a   :  { %v336_v9 = vmul.u32.u64.low %v107_v60, %v106_v8  ;;  %v337_v10 = vmul.u32.u64.high %v107_v60, %v106_v8, %v336_v9  ;;  %v339_v13 = vmul.u32.u64.low %v107_v60, %v102_v7  ;;  %v340_v14 = vmul.u32.u64.high %v107_v60, %v102_v7, %v339_v13 }
  0x3b   :  { %vm52_vm9 = vcmp.eq.f32.partialorder %v49_v43, inf  ;;  %vm54_vm10 = vcmp.eq.f32.partialorder %v49_v43, 0.0  ;;  %v55_v60 = vand.u32 2147483648, %v49_v43  ;;  %vm272_vm2 = vcmask 523264  }
  0x3c   :  { %vm116_vm5 = vc.u32 %v337_v10, %v339_v13  ;;  %v117_v17 = vadd.s32 1, %v340_v14  ;;  %v115_v32 = vadd.s32 %v339_v13, %v337_v10 }
  0x3e   :  { %v118_v18 = vsel %vm116_vm5, %v117_v17, %v340_v14 }
  0x3f   :  { %v119_v19 = vadd.s32 %v118_v18, %v114_v15 }
  0x41   :  { %v120_v21 = vadd.s32 536870912, %v119_v19 }
  0x43   :  { %v121_v23 = vshrl.u32 %v120_v21, 30  ;;  %v302_v55 = vpop.eup %301 }
  0x44   :  { %v51_v58 = vmul.f32 %v302_v55, %v49_v43 }
  0x45   :  { %v122_v25 = vshll.u32 %v121_v23, 30  ;;  %v145_v47 = vsub.s32 4, %v121_v23 }
  0x46   :  { %v53_v61 = vsel %vm52_vm9, %v49_v43, %v51_v58 }
  0x47   :  { %v123_v26 = vsub.s32 %v119_v19, %v122_v25  ;;  %v146_v50 = vsel %vm61_vm7, %v145_v47, %v121_v23  ;;  %v56_v2 = vsel %vm54_vm10, %v55_v60, %v53_v61 }
  0x48   :  { %v148_v53 = vsel %vm60_vm8, 0, %v146_v50 }
  0x49   :  { %v125_v28 = vsub.s32 0, %v123_v26  ;;  %v256_v54 = vadd.s32 3, %v148_v53  ;;  %v152_v56 = vand.u32 3, %v148_v53 }
  0x4b   :  { %v281_v29 = vmin.u32 %v125_v28, %v123_v26  ;;  %v257_v57 = vand.u32 3, %v256_v54  ;;  %vm157_vm11 = vcmp.eq.s32.totalorder %v152_v56, 2  ;;  %vm154_vm13 = vcmp.eq.s32.totalorder %v152_v56, 0 }
  0x4c   :  { %vm153_vm15 = vcmp.lt.s32.totalorder %v152_v56, 2 }
  0x4d   :  { %v127_v30 = vclz %v281_v29  ;;  %vm262_vm12 = vcmp.eq.s32.totalorder %v257_v57, 2  ;;  %vm259_vm14 = vcmp.eq.s32.totalorder %v257_v57, 0  ;;  %vm258_vm0 = vcmp.lt.s32.totalorder %v257_v57, 2 }
  0x4f   :  { %v282_v31 = vadd.s32 4294967294, %v127_v30 }
  0x51   :  { %vm283_vm6 = vcmp.lt.s32.totalorder %v282_v31, 0 }
  0x52   :  { %v130_v34 = vsel %vm283_vm6, 0, %v282_v31 }
  0x53   :  { %v131_v35 = vsub.s32 32, %v130_v34  ;;  %v132_v36 = vshll.u32 %v123_v26, %v130_v34  ;;  %v135_v37 = vsub.s32 4294967266, %v130_v34 }
  0x55   :  { %v133_v39 = vshrl.u32 %v115_v32, %v131_v35  ;;  %v136_v40 = vadd.s32 127, %v135_v37 }
  0x57   :  { %v134_v41 = vor.u32 %v133_v39, %v132_v36  ;;  %v137_v42 = vshll.u32 %v136_v40, 23 }
  0x59   :  { %v138_v44 = vor.u32 4788187, %v137_v42  ;;  %v141_v45 = vcvt.s32.f32 %v134_v41 }
  0x5b   :  { %v139_v46 = vand.u32 2147483647, %v138_v44 }
  0x5d   :  { %v142_v48 = vmul.f32 %v141_v45, %v139_v46 }
  0x5f   :  { %v143_v49 = vxor.u32 2147483648, %v142_v48 }
  0x61   :  { %v144_v51 = vsel %vm61_vm7, %v143_v49, %v142_v48 }
  0x62   :  { %v147_v52 = vsel %vm60_vm8, %v327_v22, %v144_v51 }
  0x63   :  { %303 = vcosq.f32 %v147_v52 }
  0x64   :  { %305 = vsinq.f32 %v147_v52 }
  0x6d   :  { %v304_v59 = vpop.eup %303 }
  0x6e   :  { %v306_v27 = vpop.eup %305  ;;  %v158_v62 = vxor.u32 2147483648, %v304_v59 }
  0x6f   :  { %v155_v63 = vxor.u32 2147483648, %v306_v27 }
  0x70   :  { %v159_v0 = vsel %vm157_vm11, %v158_v62, %v306_v27  ;;  %v264_v1 = vsel %vm262_vm12, %v158_v62, %v306_v27 }
  0x71   :  { %v156_v3 = vsel %vm154_vm13, %v304_v59, %v155_v63  ;;  %v261_v4 = vsel %vm259_vm14, %v304_v59, %v155_v63 }
  0x72   :  { %v160_v5 = vsel %vm153_vm15, %v156_v3, %v159_v0  ;;  %v265_v6 = vsel %vm258_vm0, %v261_v4, %v264_v1 }
  0x73   :  { %v161_v7 = vsel %vm151_vm1, nan, %v160_v5  ;;  %v266_v8 = vsel %vm151_vm1, nan, %v265_v6 }
  0x74   :  { %v162_v9 = vmul.f32 %v161_v7, %v56_v2  ;;  %v267_v10 = vmul.f32 %v266_v8, %v56_v2 }
  0x76   :  { %269 = vrot.lane.b32.xlu0 %v267_v10, %s313_s0 }
  0xe8   :  { %v270_v11 = vpop.permute.xlu0 %269 }
  0xe9   :  { %v273_v12 = vsel %vm272_vm2, %v162_v9, %v270_v11 }
  0xea   :  { %274 = vst [vmem:[%s355_s1] sm:$0xff] %v273_v12 }

</bundles_post_ra>
